<compile_context>
chip_gen: v7x
topology: tpu7x:2x2x1
jax: 0.10.0
libtpu: 0.0.40
codegen_flags: <defaults>
</compile_context>

<pallas_src>
import numpy as np

import jax
import jax.numpy as jnp
from jax.experimental import pallas as pl
from jax.experimental.pallas import tpu as pltpu

FLAT = 784           # forward() hardcodes x.reshape(batch, 784)
PADDED = 896         # 7 * 128 lanes: lane-dense compute layout (scratch only)
LANE = 128
TAIL = 768           # start of the last 128-lane slab (contains column 783)
INPUT_SIZE = 784
OUTPUT_SIZE = 784
CONNECTIONS = 2      # kernel below hardcodes the connections=2 band structure
PROWS = 8            # packed parameter rows, sublane-aligned
MAX_BLOCK_ROWS = 512 # batch tile (multiple of 8); ~8 MiB double-buffered


# ----------------------------- Pallas kernel ------------------------------ #
def _sparse_kernel(x_ref, p_ref, o_ref, xp_ref):
    # x_ref : (TB, 784) f32 input block
    # p_ref : (8, 896)  f32 packed parameter rows (resident across the grid):
    #   row 0,1 : band diagonals W[:, j] (wrap-source cols 782,783 zeroed)
    #   row 2,3 : wrap-correction rows for source cols 782, 783
    #   row 4   : precomputed bias scatter
    # o_ref : (TB, 784) f32 output block
    # xp_ref: (TB, 896) f32 VMEM scratch (lane-dense staging of x)
    tb = x_ref.shape[0]

    # Stage the 784-lane block into the 896-lane scratch; pad lanes MUST be
    # zero/finite: lane 895 wraps into output column 0 via the roll and is
    # cancelled only because w1[895] == 0 (0 * NaN would poison column 0).
    xp_ref[:, FLAT:] = jnp.zeros((tb, PADDED - FLAT), jnp.float32)
    xp_ref[:, :FLAT] = x_ref[...]
    xp = xp_ref[...]

    w0 = p_ref[0:1, :]       # diagonal j=0
    w1 = p_ref[1:2, :]       # diagonal j=1
    bias = p_ref[2 * CONNECTIONS:2 * CONNECTIONS + 1, :]

    # Band: y[c] = x[c]*W[c,0] + x[c-1]*W[c-1,1]; the lane-roll rides on the
    # XLU slot, the multiplies/adds on the VPU.
    acc = xp * w0 + pltpu.roll(xp * w1, shift=1, axis=1) + bias

    # Circular-wrap quirk (sources 782, 783) touches only output columns
    # {0, 1, 783}: apply rank-1 corrections to the first and last lane slabs.
    x782 = xp[:, FLAT - 2:FLAT - 1]
    x783 = xp[:, FLAT - 1:FLAT]
    o_ref[:, :LANE] = (acc[:, :LANE]
                       + x782 * p_ref[2:3, :LANE]
                       + x783 * p_ref[3:4, :LANE])
    o_ref[:, LANE:TAIL] = acc[:, LANE:TAIL]
    o_ref[:, TAIL:FLAT] = acc[:, TAIL:FLAT] + x783 * p_ref[3:4, TAIL:FLAT]


@jax.jit
def sparse_forward(x, params):
    # Mirrors x.reshape(x.shape[0], 784). No padded HBM copies: the kernel
    # reads/writes the 784-lane arrays directly (one masked vst per block).
    batch = x.shape[0]
    x2d = x.reshape(batch, FLAT).astype(jnp.float32)

    tb = batch if batch <= MAX_BLOCK_ROWS else MAX_BLOCK_ROWS
    grid = (pl.cdiv(batch, tb),)

    return pl.pallas_call(
        _sparse_kernel,
        out_shape=jax.ShapeDtypeStruct((batch, FLAT), jnp.float32),
        grid_spec=pltpu.PrefetchScalarGridSpec(
            num_scalar_prefetch=0,
            grid=grid,
            in_specs=[
                pl.BlockSpec((tb, FLAT), lambda i: (i, 0)),     # x block
                pl.BlockSpec((PROWS, PADDED), lambda i: (0, 0)),  # params resident
            ],
            out_specs=pl.BlockSpec((tb, FLAT), lambda i: (i, 0)),
            scratch_shapes=[pltpu.VMEM((tb, PADDED), jnp.float32)],
        ),
        compiler_params=pltpu.CompilerParams(
            dimension_semantics=("parallel",)),
    )(x2d, params)


# --------------------------- parameter set-up ----------------------------- #
def _column_map(connections):
    """Replicates the (buggy) circular scatter indices of sparse_forward."""
    ii = np.repeat(np.arange(FLAT), connections)
    jj = np.tile(np.arange(connections), FLAT)
    wrap = (ii + connections) >= FLAT
    col = np.where(wrap, (jj - ii - connections) % FLAT, ii + jj)
    return ii, jj, col


def build_params(connections=CONNECTIONS, seed=0):
    # nn.Linear(1, connections): weight (c,1), bias (c,), both U(-1, 1)
    # (fan_in = 1 => bound = 1). Deterministic synthetic init.
    assert connections == 2, "kernel's narrowed wrap corrections assume connections == 2"
    key = jax.random.PRNGKey(seed)
    kw, kb = jax.random.split(key)
    W = jax.random.uniform(kw, (FLAT, connections), jnp.float32, -1.0, 1.0)
    Bm = jax.random.uniform(kb, (FLAT, connections), jnp.float32, -1.0, 1.0)

    Wnp = np.asarray(W)
    Bnp = np.asarray(Bm)

    # Bias scatter (includes the circular wrap mapping) -> single row.
    _, _, col = _column_map(connections)
    bias = np.zeros(FLAT, np.float32)
    np.add.at(bias, col, Bnp.reshape(-1))

    wrap_start = FLAT - connections

    # Band (diagonal) weights; wrap-source columns handled via corrections.
    band = Wnp.T.copy()                 # (connections, 784); row j = W[:, j]
    band[:, wrap_start:] = 0.0

    # Per-wrap-source correction rows: contribution of x[:, i] for i >= 782
    # lands at output column (j - i - connections) % 784.
    wrap_rows = np.zeros((connections, FLAT), np.float32)
    for t, i in enumerate(range(wrap_start, FLAT)):
        for j in range(connections):
            c = (j - i - connections) % FLAT
            wrap_rows[t, c] += Wnp[i, j]

    params = np.zeros((PROWS, PADDED), np.float32)
    params[0:connections, :FLAT] = band
    params[connections:2 * connections, :FLAT] = wrap_rows
    params[2 * connections, :FLAT] = bias
    return W, Bm, jnp.asarray(params)


# ------------------------- reference (loop) impl --------------------------- #
def reference_forward(x_np, W_np, B_np, connections=CONNECTIONS):
    """Direct numpy transcription of Sparse.sparse_forward."""
    batch = x_np.shape[0]
    x2d = x_np.reshape(batch, FLAT).astype(np.float32)
    y = np.zeros((batch, OUTPUT_SIZE), np.float32)
    for i in range(INPUT_SIZE):
        out_i = x2d[:, i:i + 1] * W_np[i][None, :] + B_np[i][None, :]
        if i + connections >= FLAT:
            cutoff = i + connections - FLAT
            if cutoff > 0:
                y[:, FLAT - cutoff:FLAT] += out_i[:, :cutoff]
            if connections - cutoff > 0:
                y[:, :connections - cutoff] += out_i[:, cutoff:]
        else:
            y[:, i:i + connections] += out_i
    return y


# ---------------------------------- main ----------------------------------- #
if __name__ == "__main__":
    key = jax.random.PRNGKey(0)
    x = jax.random.normal(key, (2, 1, 28, 28), dtype=jnp.float32)  # NCHW

    W, Bm, params = build_params()

    y = sparse_forward(x, params)
    y = jax.block_until_ready(y)

    y_ref = reference_forward(np.asarray(x), np.asarray(W), np.asarray(Bm))
    np.testing.assert_allclose(np.asarray(y), y_ref, rtol=1e-4, atol=1e-4)

    print("KERNEL_OK")
</pallas_src>

<mosaic_0001>
module attributes {stable_mosaic.version = 11 : i64} {
  func.func @_sparse_kernel(%arg0: i32, %arg1: memref<2x784xf32, #tpu.memory_space<vmem>>, %arg2: memref<8x896xf32, #tpu.memory_space<vmem>>, %arg3: memref<2x784xf32, #tpu.memory_space<vmem>>, %arg4: memref<2x896xf32, #tpu.memory_space<vmem>>) attributes {dimension_semantics = [#tpu.dimension_semantics<parallel>], iteration_bounds = array<i64: 1>, scalar_prefetch = 0 : i64, scratch_operands = 1 : i64, tpu.core_type = #tpu.core_type<tc>, window_params = [{transform_indices = @transform_0, window_bounds = array<i64: 2, 784>}, {pipeline_mode = #tpu.pipeline_mode<synchronous>, transform_indices = @transform_1, window_bounds = array<i64: 8, 896>}, {transform_indices = @transform_2, window_bounds = array<i64: 2, 784>}]} {
    %cst = arith.constant 0.000000e+00 : f32
    %0 = vector.broadcast %cst : f32 to vector<2x112xf32>
    %c0 = arith.constant 0 : index
    %c784 = arith.constant 784 : index
    %1 = vector.load %arg4[%c0, %c784] : memref<2x896xf32, #tpu.memory_space<vmem>>, vector<2x112xf32>
    tpu.vector_store %arg4[%c0, %c784], %0 {strides = array<i32>} : memref<2x896xf32, #tpu.memory_space<vmem>>, vector<2x112xf32>,
    %c0_0 = arith.constant 0 : index
    %c0_1 = arith.constant 0 : index
    %2 = vector.load %arg1[%c0_0, %c0_1] : memref<2x784xf32, #tpu.memory_space<vmem>>, vector<2x784xf32>
    %c0_2 = arith.constant 0 : index
    %c0_3 = arith.constant 0 : index
    %3 = vector.load %arg4[%c0_2, %c0_3] : memref<2x896xf32, #tpu.memory_space<vmem>>, vector<2x784xf32>
    tpu.vector_store %arg4[%c0_2, %c0_3], %2 {strides = array<i32>} : memref<2x896xf32, #tpu.memory_space<vmem>>, vector<2x784xf32>,
    %c0_4 = arith.constant 0 : index
    %c0_5 = arith.constant 0 : index
    %4 = vector.load %arg4[%c0_4, %c0_5] : memref<2x896xf32, #tpu.memory_space<vmem>>, vector<2x896xf32>
    %c0_6 = arith.constant 0 : index
    %c0_7 = arith.constant 0 : index
    %5 = vector.load %arg2[%c0_6, %c0_7] : memref<8x896xf32, #tpu.memory_space<vmem>>, vector<1x896xf32>
    %c1 = arith.constant 1 : index
    %c0_8 = arith.constant 0 : index
    %6 = vector.load %arg2[%c1, %c0_8] : memref<8x896xf32, #tpu.memory_space<vmem>>, vector<1x896xf32>
    %c4 = arith.constant 4 : index
    %c0_9 = arith.constant 0 : index
    %7 = vector.load %arg2[%c4, %c0_9] : memref<8x896xf32, #tpu.memory_space<vmem>>, vector<1x896xf32>
    %8 = vector.broadcast %5 : vector<1x896xf32> to vector<2x896xf32>
    %9 = arith.mulf %4, %8 : vector<2x896xf32>
    %10 = vector.broadcast %6 : vector<1x896xf32> to vector<2x896xf32>
    %11 = arith.mulf %4, %10 : vector<2x896xf32>
    %c1_i32 = arith.constant 1 : i32
    %12 = tpu.dynamic_rotate %11 by %c1_i32 dim 1 : vector<2x896xf32>, i32 -> vector<2x896xf32>
    %13 = arith.addf %9, %12 : vector<2x896xf32>
    %14 = vector.broadcast %7 : vector<1x896xf32> to vector<2x896xf32>
    %15 = arith.addf %13, %14 : vector<2x896xf32>
    %16 = vector.extract_strided_slice %4 {offsets = [0, 782], sizes = [2, 1], strides = [1, 1]} : vector<2x896xf32> to vector<2x1xf32>
    %17 = vector.extract_strided_slice %4 {offsets = [0, 783], sizes = [2, 1], strides = [1, 1]} : vector<2x896xf32> to vector<2x1xf32>
    %18 = vector.extract_strided_slice %15 {offsets = [0, 0], sizes = [2, 128], strides = [1, 1]} : vector<2x896xf32> to vector<2x128xf32>
    %c2 = arith.constant 2 : index
    %c0_10 = arith.constant 0 : index
    %19 = vector.load %arg2[%c2, %c0_10] : memref<8x896xf32, #tpu.memory_space<vmem>>, vector<1x128xf32>
    %20 = vector.broadcast %16 : vector<2x1xf32> to vector<2x128xf32>
    %21 = vector.broadcast %19 : vector<1x128xf32> to vector<2x128xf32>
    %22 = arith.mulf %20, %21 : vector<2x128xf32>
    %23 = arith.addf %18, %22 : vector<2x128xf32>
    %c3 = arith.constant 3 : index
    %c0_11 = arith.constant 0 : index
    %24 = vector.load %arg2[%c3, %c0_11] : memref<8x896xf32, #tpu.memory_space<vmem>>, vector<1x128xf32>
    %25 = vector.broadcast %17 : vector<2x1xf32> to vector<2x128xf32>
    %26 = vector.broadcast %24 : vector<1x128xf32> to vector<2x128xf32>
    %27 = arith.mulf %25, %26 : vector<2x128xf32>
    %28 = arith.addf %23, %27 : vector<2x128xf32>
    %c0_12 = arith.constant 0 : index
    %c0_13 = arith.constant 0 : index
    %29 = vector.load %arg3[%c0_12, %c0_13] : memref<2x784xf32, #tpu.memory_space<vmem>>, vector<2x128xf32>
    tpu.vector_store %arg3[%c0_12, %c0_13], %28 {strides = array<i32>} : memref<2x784xf32, #tpu.memory_space<vmem>>, vector<2x128xf32>,
    %30 = vector.extract_strided_slice %15 {offsets = [0, 128], sizes = [2, 640], strides = [1, 1]} : vector<2x896xf32> to vector<2x640xf32>
    %c0_14 = arith.constant 0 : index
    %c128 = arith.constant 128 : index
    %31 = vector.load %arg3[%c0_14, %c128] : memref<2x784xf32, #tpu.memory_space<vmem>>, vector<2x640xf32>
    tpu.vector_store %arg3[%c0_14, %c128], %30 {strides = array<i32>} : memref<2x784xf32, #tpu.memory_space<vmem>>, vector<2x640xf32>,
    %32 = vector.extract_strided_slice %15 {offsets = [0, 768], sizes = [2, 16], strides = [1, 1]} : vector<2x896xf32> to vector<2x16xf32>
    %c3_15 = arith.constant 3 : index
    %c768 = arith.constant 768 : index
    %33 = vector.load %arg2[%c3_15, %c768] : memref<8x896xf32, #tpu.memory_space<vmem>>, vector<1x16xf32>
    %34 = vector.broadcast %17 : vector<2x1xf32> to vector<2x16xf32>
    %35 = vector.broadcast %33 : vector<1x16xf32> to vector<2x16xf32>
    %36 = arith.mulf %34, %35 : vector<2x16xf32>
    %37 = arith.addf %32, %36 : vector<2x16xf32>
    %c0_16 = arith.constant 0 : index
    %c768_17 = arith.constant 768 : index
    %38 = vector.load %arg3[%c0_16, %c768_17] : memref<2x784xf32, #tpu.memory_space<vmem>>, vector<2x16xf32>
    tpu.vector_store %arg3[%c0_16, %c768_17], %37 {strides = array<i32>} : memref<2x784xf32, #tpu.memory_space<vmem>>, vector<2x16xf32>,
    return
  }
  func.func @transform_0(%arg0: i32) -> (i32, i32) {
    %c0_i32 = arith.constant 0 : i32
    %c0_i32_0 = arith.constant 0 : i32
    return %arg0, %c0_i32 : i32, i32
  }
  func.func @transform_1(%arg0: i32) -> (i32, i32) {
    %c0_i32 = arith.constant 0 : i32
    %c0_i32_0 = arith.constant 0 : i32
    %c0_i32_1 = arith.constant 0 : i32
    return %c0_i32, %c0_i32_0 : i32, i32
  }
  func.func @transform_2(%arg0: i32) -> (i32, i32) {
    %c0_i32 = arith.constant 0 : i32
    %c0_i32_0 = arith.constant 0 : i32
    return %arg0, %c0_i32 : i32, i32
  }
}

</mosaic_0001>

<bundles_post_ra>
// kernel: sparse_forward.1
= control target key start
LH: loop header
LB: loop body
LE: loop exit
PB: predicated region body
PF: predicated region fallthrough
CT: control target
= control target key end

     0   :  { %v37_v2 = vlaneseq  ;;  %v442_v5 = vmov 1983009808   ;;  %vm12_vm0 = vcmask 1041536   ;;  %vm17_vm1 = vcmask 1041408   ;;  %s586_s0 = inlined_call_operand.vmem [shape: f32[2,784], index: 0, kind: input, shape index: {}]   ;;  %s587_s1 = inlined_call_operand.vmem [shape: f32[8,896], index: 1, kind: input, shape index: {}]   ;;  %s588_s2 = inlined_call_operand.hbm [shape: f32[2,784], index: 2, kind: output, shape index: {}]  }
   0x1   :  { %v467_v0 = vld [vmem:[%s586_s0] sm:$0xff]  ;;  %v68_v6 = vunpack.c.l.s4 %v442_v5 }
   0x2   :  { %v25_v1 = vld [vmem:[%s587_s1] ss:$8 sm:$0xf]  ;;  %v405_v4 = vld [vmem:[%s587_s1 + $0x1] ss:$8 sm:$0xf] }
   0x3   :  { %v26_v3 = vld [vmem:[%s587_s1] ss:$8 sm:$0xf0]  ;;  %v406_v8 = vld [vmem:[%s587_s1 + $0x1] ss:$8 sm:$0xf0]  ;;  %v69_v11 = vunpack.c.0.s8 %v68_v6 }
   0x4   :  { %v478_v7 = vor.u32 %v26_v3, %v25_v1  ;;  %v484_v9 = vshrl.u32 %v37_v2, 7  ;;  %v31_v10 = vor.u32 %v406_v8, %v405_v4 }
   0x5   :  { %7 = vsyncpa [#allocation4], 0  ;;  %v443_v16 = vmov 0.0   ;;  %v15_v18 = vld [vmem:[%s586_s0 + $0x8] sm:$0x3f]  ;;  %vm18_vm2 = vcmask 1043458  }
   0x6   :  { %v487_v12 = vsub.s32 0, %v484_v9  ;;  %v490_v13 = vsub.s32 1, %v484_v9  ;;  %v493_v14 = vsub.s32 2, %v484_v9  ;;  %v496_v15 = vsub.s32 3, %v484_v9  ;;  %13 = vst.msk [vmem:[#allocation2 + $0xc] sm:$0x3] %vm12_vm0, %v443_v16  ;;  %vm19_vm4 = vmor %vm18_vm2, %vm17_vm1 }
   0x7   :  { %v499_v17 = vsub.s32 %v69_v11, %v484_v9  ;;  %vm20_vm3 = vcmask 128004   ;;  %v505_v19 = vsub.s32 4, %v484_v9  ;;  %v59_v30 = vsub.s32 5, %v484_v9  ;;  %v407_v51 = vld [vmem:[%s587_s1 + $0x4] ss:$8 sm:$0xf] }
   0x8   :  { %v40_v20 = vrot.slane %v478_v7, %v487_v12  ;;  %v44_v21 = vrot.slane %v478_v7, %v490_v13  ;;  %v48_v22 = vrot.slane %v478_v7, %v493_v14  ;;  %v52_v23 = vrot.slane %v478_v7, %v496_v15  ;;  %vm21_vm5 = vmor %vm20_vm3, %vm19_vm4  ;;  %v408_v52 = vld [vmem:[%s587_s1 + $0x4] ss:$8 sm:$0xf0]  ;;  %s446_s24 = smov 1   ;;  %s448_s3 = smov [#allocation3]  }
   0x9   :  { %v106_v24 = vrot.slane %v31_v10, %v487_v12  ;;  %v110_v25 = vrot.slane %v31_v10, %v490_v13  ;;  %v114_v26 = vrot.slane %v31_v10, %v493_v14  ;;  %v118_v27 = vrot.slane %v31_v10, %v496_v15  ;;  %22 = vst.msk [vmem:[#allocation2 + $0x8] sm:$0x3f] %vm21_vm5, %v15_v18  ;;  %s397_s4 = sshll.u32 %s448_s3, 4  ;;  %s398_s4 = int_to_ptr.vmem [resolvable:$true] %s397_s4 }
   0xa   :  { %v65_v28 = vcombine.low %v40_v20, %v44_v21  ;;  %v66_v29 = vcombine.low %v48_v22, %v52_v23  ;;  %v63_v31 = vsub.s32 6, %v484_v9  ;;  %v122_v34 = vrot.slane %v31_v10, %v505_v19  ;;  %s418_s5 = scalar_lea.vmem %s398_s4, 224  ;;  %p423_p1 = scmp.lt.s32.totalorder %s398_s4, %s398_s4 }
   0xb   :  { %v131_v32 = vcombine.low %v106_v24, %v110_v25  ;;  %v132_v33 = vcombine.low %v114_v26, %v118_v27  ;;  %v126_v37 = vrot.slane %v31_v10, %v59_v30  ;;  %v444_v39 = vmov 14   ;;  %p419_p0 = scmp.ne.s32.totalorder %s398_s4, %s418_s5  ;;  %p424_p2 = scmp.lt.s32.totalorder %s418_s5, %s418_s5 }
   0xc   :  { %v73_v35 = vrot.slane %v65_v28, %v499_v17  ;;  %v80_v36 = vrot.slane %v66_v29, %v499_v17  ;;  %v130_v38 = vrot.slane %v31_v10, %v63_v31  ;;  %416 = vset.pattern.permute.xlu1 %v444_v39  ;;  %v445_v45 = vmov 15  }
   0xd   :  { %v139_v40 = vrot.slane %v131_v32, %v499_v17  ;;  %v146_v41 = vrot.slane %v132_v33, %v499_v17  ;;  %v148_v43 = vcombine.low %v122_v34, %v126_v37  ;;  %417 = vset.pattern.permute.xlu0 %v445_v45  ;;  %v56_v47 = vrot.slane %v478_v7, %v505_v19  ;;  %p425_p3 = por %p424_p2, %p423_p1 }
   0xe   :  { %v81_v42 = vcombine.low %v73_v35, %v80_v36  ;;  %v162_v44 = vrot.slane %v130_v38, %v499_v17  ;;  %v60_v48 = vrot.slane %v478_v7, %v59_v30  ;;  %v64_v55 = vrot.slane %v478_v7, %v63_v31 }
   0xf   :  { %v147_v46 = vcombine.low %v139_v40, %v146_v41  ;;  %v155_v50 = vrot.slane %v148_v43, %v499_v17  ;;  %v35_v57 = vor.u32 %v408_v52, %v407_v51  ;;  %v447_v51 = vmov 1414812756   ;;  %p426_p4 = pnand %p425_p3, %p419_p0 }
  0x10   :  { %v532_v49 = vmul.f32 %v81_v42, %v467_v0  ;;  %v24_v54 = vld [vmem:[#allocation2 + $0x8] sm:$0x3f]  ;;  %v82_v56 = vcombine.low %v56_v47, %v60_v48  ;;  %v96_v62 = vrot.slane %v64_v55, %v499_v17  ;;  %v351_v52 = vunpack.c.l.s4 %v447_v51 }
  0x11   :  { %v166_v53 = vmul.f32 %v147_v46, %v467_v0  ;;  %v163_v58 = vcombine.low %v155_v50, %v162_v44  ;;  %v298_v1 = vrot.slane %v35_v57, %v505_v19  ;;  %v302_v3 = vrot.slane %v35_v57, %v59_v30 }
  0x12   :  { %v89_v61 = vrot.slane %v82_v56, %v499_v17  ;;  %v282_v5 = vrot.slane %v35_v57, %v487_v12  ;;  %v286_v7 = vrot.slane %v35_v57, %v490_v13  ;;  %v290_v8 = vrot.slane %v35_v57, %v493_v14 }
  0x13   :  { %v177_v59 = vrot.slane %v166_v53, %v499_v17  ;;  %v170_v60 = vcombine.high %v166_v53, %v166_v53  ;;  %v167_v63 = vmul.f32 %v163_v58, %v24_v54  ;;  %v294_v11 = vrot.slane %v35_v57, %v496_v15 }
  0x14   :  { %v97_v4 = vcombine.low %v89_v61, %v96_v62  ;;  %v306_v16 = vrot.slane %v35_v57, %v63_v31  ;;  %v307_v19 = vcombine.low %v282_v5, %v286_v7  ;;  %v324_v20 = vcombine.low %v298_v1, %v302_v3  ;;  %v384_v3 = vld [vmem:[%s587_s1 + $0x33] ss:$0 sm:$0xff] }
  0x15   :  { %210 = vrot.lane.b32.xlu0 %v177_v59, %s446_s24  ;;  %v184_v0 = vrot.slane %v170_v60, %v499_v17  ;;  %v194_v6 = vrot.slane %v167_v63, %v499_v17  ;;  %v185_v21 = vcombine.high %v177_v59, %v177_v59  ;;  %v187_v22 = vcombine.high %v167_v63, %v167_v63 }
  0x16   :  { %v101_v10 = vmul.f32 %v97_v4, %v24_v54  ;;  %v308_v23 = vcombine.low %v290_v8, %v294_v11  ;;  %v338_v12 = vrot.slane %v306_v16, %v499_v17  ;;  %v315_v24 = vrot.slane %v307_v19, %v499_v17 }
  0x17   :  { %214 = vrot.lane.b32.xlu1 %v184_v0, %s446_s24  ;;  %v202_v18 = vcombine.high %v194_v6, %v194_v6  ;;  %v331_v13 = vrot.slane %v324_v20, %v499_v17  ;;  %v186_v25 = vcombine.high %v184_v0, %v184_v0  ;;  %v201_v15 = vrot.slane %v187_v22, %v499_v17 }
  0x18   :  { %v322_v14 = vrot.slane %v308_v23, %v499_v17  ;;  %v225_v31 = vand.u32 127, %v37_v2  ;;  %v352_v55 = vunpack.c.0.s8 %v351_v52  ;;  %vm378_vm7 = vcmask 1045504  }
  0x19   :  { %218 = vrot.lane.b32.xlu0 %v194_v6, %s446_s24  ;;  %v339_v26 = vcombine.low %v331_v13, %v338_v12  ;;  %vm389_vm8 = vcmask 123904  }
  0x1a   :  { %v323_v27 = vcombine.low %v315_v24, %v322_v14  ;;  %vm226_vm6 = vcmp.lt.s32.totalorder %v225_v31, 1  ;;  %v355_v60 = vsub.s32 %v352_v55, %v484_v9 }
  0x1b   :  { %220 = vrot.lane.b32.xlu1 %v202_v18, %s446_s24 }
  0x1d   :  { %212 = vrot.lane.b32.xlu0 %v185_v21, %s446_s24 }
  0x1f   :  { %216 = vrot.lane.b32.xlu1 %v186_v25, %s446_s24 }
  0x21   :  { %222 = vrot.lane.b32.xlu0 %v201_v15, %s446_s24 }
  0x23   :  { %347 = vperm.xlu1 %416, %v24_v54  }
  0x25   :  { %361 = vperm.xlu0 %417, %v24_v54  }
  0x87   :  { %v211_v28 = vpop.permute.xlu0 %210 }
  0x89   :  { %v215_v29 = vpop.permute.xlu1 %214 }
  0x8b   :  { %v219_v30 = vpop.permute.xlu0 %218 }
  0x8d   :  { %v221_v32 = vpop.permute.xlu1 %220 }
  0x8e   :  { %v228_v35 = vsel %vm226_vm6, %v219_v30, %v221_v32 }
  0x8f   :  { %v213_v33 = vpop.permute.xlu0 %212 }
  0x90   :  { %v231_v36 = vsel %vm226_vm6, %v213_v33, %v215_v29  ;;  %v232_v42 = vsel %vm226_vm6, %v211_v28, %v213_v33 }
  0x91   :  { %v217_v34 = vpop.permute.xlu1 %216 }
  0x92   :  { %v229_v37 = vsel %vm226_vm6, %v217_v34, %v219_v30  ;;  %v230_v38 = vsel %vm226_vm6, %v215_v29, %v217_v34 }
  0x93   :  { %v242_v39 = vcombine.low %v231_v36, %v230_v38  ;;  %v258_v40 = vcombine.low %v229_v37, %v228_v35  ;;  %v223_v41 = vpop.permute.xlu0 %222 }
  0x94   :  { %v227_v43 = vsel %vm226_vm6, %v221_v32, %v223_v41  ;;  %v233_v44 = vsel %vm226_vm6, %v223_v41, %v211_v28 }
  0x95   :  { %v265_v45 = vrot.slane %v258_v40, %v499_v17  ;;  %v241_v46 = vcombine.low %v233_v44, %v232_v42  ;;  %v272_v47 = vrot.slane %v227_v43, %v499_v17  ;;  %v256_v2 = vrot.slane %v242_v39, %v499_v17 }
  0x97   :  { %v249_v48 = vrot.slane %v241_v46, %v499_v17  ;;  %v273_v50 = vcombine.low %v265_v45, %v272_v47  ;;  %v344_v17 = vld [vmem:[%s587_s1 + $0x2] ss:$0 sm:$0xff] }
  0x99   :  { %v257_v53 = vcombine.low %v249_v48, %v256_v2  ;;  %v277_v54 = vadd.f32 %v273_v50, %v101_v10 }
  0x9b   :  { %v276_v56 = vadd.f32 %v257_v53, %v532_v49  ;;  %v343_v57 = vadd.f32 %v339_v26, %v277_v54  ;;  %v359_v49 = vld [vmem:[%s587_s1 + $0x3] ss:$0 sm:$0xff] }
  0x9d   :  { %v342_v58 = vadd.f32 %v323_v27, %v276_v56  ;;  %v377_v59 = vrot.slane %v343_v57, 2  ;;  %v386_v8 = vrot.slane %v343_v57, 4 }
  0x9f   :  { %v376_v61 = vrot.slane %v342_v58, 2  ;;  %383 = vst [vmem:[#allocation3 + $0xa] sm:$0x3] %v377_v59 }
  0xa1   :  { %v379_v62 = vsel %vm378_vm7, %v376_v61, %v377_v59 }
  0xa2   :  { %v348_v63 = vpop.permute.xlu1 %347  ;;  %382 = vst [vmem:[#allocation3 + $0x2] sm:$0xff] %v379_v62 }
  0xa3   :  { %v356_v1 = vrot.slane %v348_v63, %v355_v60 }
  0xa4   :  { %v362_v0 = vpop.permute.xlu0 %361 }
  0xa5   :  { %v357_v9 = vmul.f32 %v356_v1, %v344_v17  ;;  %v370_v4 = vrot.slane %v362_v0, %v355_v60 }
  0xa7   :  { %v358_v5 = vadd.f32 %v357_v9, %v342_v58  ;;  %v371_v6 = vmul.f32 %v370_v4, %v359_v49  ;;  %v385_v7 = vmul.f32 %v384_v3, %v370_v4 }
  0xa9   :  { %v372_v10 = vadd.f32 %v371_v6, %v358_v5  ;;  %v388_v11 = vadd.f32 %v386_v8, %v385_v7 }
  0xab   :  { %373 = vst [vmem:[#allocation3] sm:$0x3] %v372_v10  ;;  %390 = vst.msk [vmem:[#allocation3 + $0xc] sm:$0x3] %vm389_vm8, %v388_v11 }
  0xac   :  { %429 = shalt.err (!%p426_p4)
}
  0xad   :  { %s430_s7 = scalar_lea.hbm %s588_s2, 224 }
  0xae   :  { %p431_p5 = scmp.ne.s32.totalorder %s588_s2, %s430_s7  ;;  %p434_p6 = scmp.lt.u32.totalorder %s430_s7, %s588_s2 }
  0xb0   :  { %p436_p7 = pnand %p434_p6, %p431_p5 }
  0xb2   :  { %439 = shalt.err (!%p436_p7)
}
  0xb3   :  { %400 = dma.vmem_to_hbm [thread:$0]  %s398_s4, 224, %s588_s2, [#allocation4]  }
  0xb4   :  { %440 = dma.done.wait [#allocation4], 224  }
  0xb5   :  { %441 = vsyncadd [#allocation4], 4294967072 }
  0xb6   :  { %404 = vsyncpa [#allocation4], 1 }

</bundles_post_ra>
